<compile_context>
chip_gen: v5e
topology: v5e:2x2
jax: 0.10.0
libtpu: 0.0.40
codegen_flags: <defaults>
</compile_context>

<pallas_src>
import functools

import jax
import jax.numpy as jnp
from jax.experimental import pallas as pl
from jax.experimental.pallas import tpu as pltpu


def _int_pow(r, n: int):
    """r**n for integer n >= 1 via exponentiation by squaring (VPU multiplies only)."""
    result = None
    base = r
    while n > 0:
        if n & 1:
            result = base if result is None else result * base
        n >>= 1
        if n:
            base = base * base
    return result


def _poly_cutoff_kernel(x_ref, o_ref, *, p: float, r_max: float, use_int_pow: bool):
    # NOTE: with a cdiv grid the last row-block may be partially out-of-bounds.
    # Those lanes read unspecified padding and may compute inf/NaN — harmless,
    # because Pallas drops the corresponding out-of-bounds stores. Do not "fix".
    x = x_ref[...]

    # Compute in f32: the envelope is a near-cancellation of large coefficients
    # near x -> r_max; bf16/f16 math loses most significant bits there.  The
    # extra converts are free (VPU has huge slack vs. the HBM roofline).
    xf = x.astype(jnp.float32)
    r = xf * (1.0 / r_max)               # hoisted reciprocal, folded at trace time

    if use_int_pow:
        rp = _int_pow(r, int(p))         # r^p via repeated squaring (no EUP)
    else:
        rp = jnp.power(r, float(p))      # fallback for non-integer p

    c0 = (p + 1.0) * (p + 2.0) / 2.0
    c1 = p * (p + 2.0)
    c2 = p * (p + 1.0) / 2.0

    # envelope = 1 - c0*r^p + c1*r^(p+1) - c2*r^(p+2), Horner-folded.
    envelope = 1.0 + rp * (r * (c1 - c2 * r) - c0)

    # Match torch semantics exactly: envelope * (x < r_max).
    mask = (xf < r_max).astype(jnp.float32)
    o_ref[...] = (envelope * mask).astype(o_ref.dtype)


def _choose_block_rows(rows: int, max_block_rows: int, sublane: int) -> int:
    """Pick the row-tile size.

    Targets >= ~4 grid steps so small/medium inputs still pipeline and the
    'parallel' grid axis can shard across both v7x TensorCores, while capping
    the tile at max_block_rows (512 x 1024 f32 = 2 MiB; ~8 MiB double-buffered
    in+out, safely under v5e's 16 MiB scoped-VMEM default).
    """
    if rows < 2 * sublane:
        return rows                                    # tiny: one full-extent block
    target = pl.cdiv(rows, 4)
    target = pl.cdiv(target, sublane) * sublane        # sublane-aligned tile
    return max(sublane, min(target, max_block_rows))


def polynomial_cutoff(x, r_max: float, p: float = 6.0, *,
                      lane_width: int = 1024, max_block_rows: int = 512):
    """Apply PolynomialCutoff elementwise to an array of any shape."""
    orig_shape = x.shape
    dtype = x.dtype
    n = int(x.size)

    flat = jnp.reshape(x, (-1,))                       # free for contiguous arrays
    rows = pl.cdiv(n, lane_width)

    padded = (rows * lane_width != n)
    if padded:
        # Pad only up to the next lane_width multiple (<= lane_width-1 elements).
        # Zeros give envelope=1, mask=1 -> finite values, sliced away below.
        flat = jnp.pad(flat, (0, rows * lane_width - n))
    x2d = flat.reshape(rows, lane_width)

    itemsize = dtype.itemsize
    sublane = 8 if itemsize >= 4 else (16 if itemsize == 2 else 32)
    block_rows = _choose_block_rows(rows, max_block_rows, sublane)
    grid = (pl.cdiv(rows, block_rows),)   # partial last block handled by Pallas

    use_int_pow = float(p).is_integer() and float(p) >= 1.0
    kernel = functools.partial(
        _poly_cutoff_kernel, p=float(p), r_max=float(r_max), use_int_pow=use_int_pow)

    n_proc = rows * lane_width
    cost = pl.CostEstimate(
        flops=(13 if use_int_pow else 16) * n_proc,
        transcendentals=0 if use_int_pow else n_proc,
        bytes_accessed=2 * n_proc * itemsize)

    out2d = pl.pallas_call(
        kernel,
        out_shape=jax.ShapeDtypeStruct((rows, lane_width), dtype),
        grid_spec=pltpu.PrefetchScalarGridSpec(
            num_scalar_prefetch=0,
            grid=grid,
            in_specs=[pl.BlockSpec((block_rows, lane_width), lambda i: (i, 0))],
            out_specs=pl.BlockSpec((block_rows, lane_width), lambda i: (i, 0)),
        ),
        compiler_params=pltpu.CompilerParams(
            dimension_semantics=("parallel",)),
        cost_estimate=cost,
    )(x2d)

    if padded:
        return out2d.reshape(-1)[:n].reshape(orig_shape)
    return out2d.reshape(orig_shape)


def polynomial_cutoff_ref(x, r_max, p=6.0):
    x = x.astype(jnp.float32)
    r = x / r_max
    env = (1.0
           - (p + 1.0) * (p + 2.0) / 2.0 * jnp.power(r, p)
           + p * (p + 2.0) * jnp.power(r, p + 1.0)
           - p * (p + 1.0) / 2.0 * jnp.power(r, p + 2.0))
    return env * (x < r_max).astype(jnp.float32)


if __name__ == "__main__":
    key = jax.random.PRNGKey(0)
    r_max = 5.0
    p = 6.0
    k1, k2, k3, k4, k5 = jax.random.split(key, 5)

    # Case 1: 4-D "distance" tensor, size % 1024 == 0 -> no pad, no slice.
    x1 = jax.random.uniform(k1, (2, 4, 16, 16), dtype=jnp.float32, minval=0.0, maxval=8.0)
    out1 = jax.block_until_ready(polynomial_cutoff(x1, r_max=r_max, p=p))
    assert out1.shape == x1.shape and out1.dtype == x1.dtype
    assert jnp.allclose(out1, polynomial_cutoff_ref(x1, r_max, p), atol=1e-5, rtol=1e-5)

    # Case 2: small ragged shape -> minimal pad + slice path.
    x2 = jax.random.uniform(k2, (3, 50), dtype=jnp.float32, minval=0.0, maxval=8.0)
    out2 = jax.block_until_ready(polynomial_cutoff(x2, r_max=r_max, p=p))
    assert out2.shape == x2.shape and out2.dtype == x2.dtype
    assert jnp.allclose(out2, polynomial_cutoff_ref(x2, r_max, p), atol=1e-5, rtol=1e-5)

    # Case 3: ragged + multi-step grid with a partial (masked) last block.
    x3 = jax.random.uniform(k3, (3, 80, 80), dtype=jnp.float32, minval=0.0, maxval=8.0)
    out3 = jax.block_until_ready(polynomial_cutoff(x3, r_max=r_max, p=p))
    assert out3.shape == x3.shape
    assert jnp.allclose(out3, polynomial_cutoff_ref(x3, r_max, p), atol=1e-5, rtol=1e-5)

    # Case 4: divisible multi-step grid (no pad, grid > 1).
    x4 = jax.random.uniform(k4, (32, 32, 32), dtype=jnp.float32, minval=0.0, maxval=8.0)
    out4 = jax.block_until_ready(polynomial_cutoff(x4, r_max=r_max, p=p))
    assert out4.shape == x4.shape
    assert jnp.allclose(out4, polynomial_cutoff_ref(x4, r_max, p), atol=1e-5, rtol=1e-5)

    # Case 5: bf16 input -> internal f32 compute, bf16 output.
    x5 = jax.random.uniform(k5, (4, 16, 16), dtype=jnp.float32, minval=0.0, maxval=8.0
                            ).astype(jnp.bfloat16)
    out5 = jax.block_until_ready(polynomial_cutoff(x5, r_max=r_max, p=p))
    assert out5.shape == x5.shape and out5.dtype == jnp.bfloat16
    ref5 = polynomial_cutoff_ref(x5, r_max, p).astype(jnp.bfloat16)
    assert jnp.allclose(out5.astype(jnp.float32), ref5.astype(jnp.float32),
                        atol=1e-2, rtol=1e-2)

    print("KERNEL_OK")
</pallas_src>

<mosaic_0001>
module attributes {stable_mosaic.version = 11 : i64} {
  func.func @_poly_cutoff_kernel(%arg0: i32, %arg1: memref<2x1024xf32, #tpu.memory_space<vmem>>, %arg2: memref<2x1024xf32, #tpu.memory_space<vmem>>) attributes {dimension_semantics = [#tpu.dimension_semantics<parallel>], iteration_bounds = array<i64: 1>, scalar_prefetch = 0 : i64, scratch_operands = 0 : i64, tpu.core_type = #tpu.core_type<tc>, window_params = [{transform_indices = @transform_0, window_bounds = array<i64: 2, 1024>}, {transform_indices = @transform_1, window_bounds = array<i64: 2, 1024>}]} {
    %c0 = arith.constant 0 : index
    %c0_0 = arith.constant 0 : index
    %0 = vector.load %arg1[%c0, %c0_0] : memref<2x1024xf32, #tpu.memory_space<vmem>>, vector<2x1024xf32>
    %cst = arith.constant 2.000000e-01 : f32
    %1 = vector.broadcast %cst : f32 to vector<2x1024xf32>
    %2 = arith.mulf %0, %1 : vector<2x1024xf32>
    %3 = arith.mulf %2, %2 : vector<2x1024xf32>
    %4 = arith.mulf %3, %3 : vector<2x1024xf32>
    %5 = arith.mulf %3, %4 : vector<2x1024xf32>
    %cst_1 = arith.constant 2.100000e+01 : f32
    %6 = vector.broadcast %cst_1 : f32 to vector<2x1024xf32>
    %7 = arith.mulf %6, %2 : vector<2x1024xf32>
    %cst_2 = arith.constant 4.800000e+01 : f32
    %8 = vector.broadcast %cst_2 : f32 to vector<2x1024xf32>
    %9 = arith.subf %8, %7 : vector<2x1024xf32>
    %10 = arith.mulf %2, %9 : vector<2x1024xf32>
    %cst_3 = arith.constant 2.800000e+01 : f32
    %11 = vector.broadcast %cst_3 : f32 to vector<2x1024xf32>
    %12 = arith.subf %10, %11 : vector<2x1024xf32>
    %13 = arith.mulf %5, %12 : vector<2x1024xf32>
    %cst_4 = arith.constant 1.000000e+00 : f32
    %14 = vector.broadcast %cst_4 : f32 to vector<2x1024xf32>
    %15 = arith.addf %14, %13 : vector<2x1024xf32>
    %cst_5 = arith.constant 5.000000e+00 : f32
    %16 = vector.broadcast %cst_5 : f32 to vector<2x1024xf32>
    %17 = arith.cmpf olt, %0, %16 : vector<2x1024xf32>
    %18 = arith.extui %17 : vector<2x1024xi1> to vector<2x1024xi32>
    %19 = arith.sitofp %18 : vector<2x1024xi32> to vector<2x1024xf32>
    %20 = arith.mulf %15, %19 : vector<2x1024xf32>
    %c0_6 = arith.constant 0 : index
    %c0_7 = arith.constant 0 : index
    %21 = vector.load %arg2[%c0_6, %c0_7] : memref<2x1024xf32, #tpu.memory_space<vmem>>, vector<2x1024xf32>
    tpu.vector_store %arg2[%c0_6, %c0_7], %20 {strides = array<i32>} : memref<2x1024xf32, #tpu.memory_space<vmem>>, vector<2x1024xf32>,
    return
  }
  func.func @transform_0(%arg0: i32) -> (i32, i32) {
    %c0_i32 = arith.constant 0 : i32
    %c0_i32_0 = arith.constant 0 : i32
    return %arg0, %c0_i32 : i32, i32
  }
  func.func @transform_1(%arg0: i32) -> (i32, i32) {
    %c0_i32 = arith.constant 0 : i32
    %c0_i32_0 = arith.constant 0 : i32
    return %arg0, %c0_i32 : i32, i32
  }
}

</mosaic_0001>

<bundles_post_ra>
// kernel: tpu_custom_call.1
= control target key start
LH: loop header
LB: loop body
LE: loop exit
PB: predicated region body
PF: predicated region fallthrough
CT: control target
= control target key end

     0   :  { %6 = vsyncpa [#allocation3], 0  ;;  %s150_s0 = inlined_call_operand.hbm [shape: f32[2,1024], index: 0, kind: input, shape index: {}]   ;;  %s151_s1 = inlined_call_operand.hbm [shape: f32[2,1024], index: 1, kind: output, shape index: {}]  }
   0x1   :  { %7 = vsyncpa [#allocation4], 0  ;;  %s13_s8 = sshll.u32 %s150_s0, 4  ;;  %s131_s9 = smov [#allocation2]   ;;  %s14_s8 = int_to_ptr.hbm [resolvable:$true] %s13_s8 }
   0x2   :  { %s15_s10 = sshll.u32 %s131_s9, 4  ;;  %s16_s10 = int_to_ptr.vmem [resolvable:$true] %s15_s10 }
   0x3   :  { %18 = dma.hbm_to_vmem [thread:$0]  %s14_s8, 256, %s16_s10, [#allocation3]  }
   0x4   :  { %127 = dma.done.wait [#allocation3], 256  }
   0x5   :  { %128 = vsyncadd [#allocation3], 4294967040  ;;  %v23_v0 = vld [vmem:[#allocation2] sm:$0xff]  ;;  %v24_v1 = vld [vmem:[#allocation2 + $0x8] sm:$0xff]  ;;  %v132_v20 = vmov 0.0   ;;  %s133_s0 = smov [#allocation5]  }
   0x6   :  { %v25_v2 = vmul.f32 0.2, %v23_v0  ;;  %v26_v3 = vmul.f32 0.2, %v24_v1  ;;  %vm45_vm0 = vcmp.lt.f32.partialorder %v23_v0, 5.0  ;;  %vm46_vm1 = vcmp.lt.f32.partialorder %v24_v1, 5.0 }
   0x7   :  { %v74_v21 = vsel %vm45_vm0, 1.0, %v132_v20  ;;  %v75_v22 = vsel %vm46_vm1, 1.0, %v132_v20  ;;  %s60_s11 = sshll.u32 %s133_s0, 4  ;;  %s62_s14 = sshll.u32 %s151_s1, 4  ;;  %s61_s11 = int_to_ptr.vmem [resolvable:$true] %s60_s11  ;;  %s63_s14 = int_to_ptr.hbm [resolvable:$true] %s62_s14 }
   0x8   :  { %v27_v4 = vmul.f32 %v25_v2, %v25_v2  ;;  %v33_v5 = vmul.f32 21.0, %v25_v2  ;;  %v28_v6 = vmul.f32 %v26_v3, %v26_v3  ;;  %v34_v7 = vmul.f32 21.0, %v26_v3 }
   0xa   :  { %v29_v8 = vmul.f32 %v27_v4, %v27_v4  ;;  %v35_v9 = vsub.f32 48.0, %v33_v5  ;;  %v30_v10 = vmul.f32 %v28_v6, %v28_v6  ;;  %v36_v11 = vsub.f32 48.0, %v34_v7 }
   0xc   :  { %v31_v12 = vmul.f32 %v29_v8, %v27_v4  ;;  %v37_v13 = vmul.f32 %v35_v9, %v25_v2  ;;  %v32_v14 = vmul.f32 %v30_v10, %v28_v6  ;;  %v38_v15 = vmul.f32 %v36_v11, %v26_v3 }
   0xe   :  { %v72_v16 = vadd.f32 -28.0, %v37_v13  ;;  %v73_v17 = vadd.f32 -28.0, %v38_v15 }
  0x10   :  { %v41_v18 = vmul.f32 %v72_v16, %v31_v12  ;;  %v42_v19 = vmul.f32 %v73_v17, %v32_v14 }
  0x12   :  { %v43_v23 = vadd.f32 1.0, %v41_v18  ;;  %v44_v24 = vadd.f32 1.0, %v42_v19 }
  0x14   :  { %v51_v25 = vmul.f32 %v74_v21, %v43_v23  ;;  %v52_v26 = vmul.f32 %v75_v22, %v44_v24 }
  0x16   :  { %53 = vst [vmem:[#allocation5] sm:$0xff] %v51_v25 }
  0x17   :  { %54 = vst [vmem:[#allocation5 + $0x8] sm:$0xff] %v52_v26 }
  0x18   :  { %65 = dma.vmem_to_hbm [thread:$0]  %s61_s11, 256, %s63_s14, [#allocation4]  }
  0x19   :  { %129 = dma.done.wait [#allocation4], 256  }
  0x1a   :  { %130 = vsyncadd [#allocation4], 4294967040 }
  0x1b   :  { %70 = vsyncpa [#allocation3], 1 }
  0x1c   :  { %71 = vsyncpa [#allocation4], 1 }

</bundles_post_ra>
